<compile_context>
chip_gen: v6e
topology: v6e:2x2x1
jax: 0.10.0
libtpu: 0.0.40
codegen_flags: <defaults>
</compile_context>

<pallas_src>
from functools import partial

import jax
import jax.numpy as jnp
import numpy as np
from jax.experimental import pallas as pl
from jax.experimental.pallas import tpu as pltpu


def attention_kernel(enc_ref, dec_ref, we_ref, be_ref, wf_ref, bf_ref,
                     ctx_ref, alpha_ref, *, matmul_dtype=None):
    b_blk, n, e = enc_ref.shape
    a_dim = we_ref.shape[1]

    enc = enc_ref[...]                               # (B_BLK, N, E)
    mm_dtype = matmul_dtype if matmul_dtype is not None else enc.dtype

    # --- encoder projection: one big MXU GEMM over the flattened batch block.
    enc2d = enc.reshape(b_blk * n, e)                # (B_BLK*N, E)
    enc_att = jnp.dot(enc2d.astype(mm_dtype),
                      we_ref[...].astype(mm_dtype),
                      preferred_element_type=jnp.float32) + be_ref[...]
    enc_att = enc_att.reshape(b_blk, n, a_dim)       # (B_BLK, N, A)

    # --- add (precomputed) decoder projection, relu.             [VPU]
    s = jnp.maximum(enc_att + dec_ref[...][:, None, :], 0.0)      # (B_BLK, N, A)

    # --- full_att: lane-dense multiply + lane reduce against w_f row instead
    #     of a single-output-column matmul.                        [VPU + XLU]
    a = jnp.sum(s * wf_ref[...][None, :, :], axis=-1) + bf_ref[0]  # (B_BLK, N)

    # --- softmax over N (the lane axis).                          [XLU + EUP]
    m = jnp.max(a, axis=-1, keepdims=True)
    ex = jnp.exp(a - m)
    alpha = ex / jnp.sum(ex, axis=-1, keepdims=True)               # (B_BLK, N)

    # --- context: batched MXU contraction (1,N) @ (N,E) per batch element.
    ctx = jnp.einsum('bqn,bne->bqe',
                     alpha[:, None, :].astype(mm_dtype),
                     enc.astype(mm_dtype),
                     preferred_element_type=jnp.float32)[:, 0, :]  # (B_BLK, E)

    ctx_ref[...] = ctx.astype(ctx_ref.dtype)
    alpha_ref[...] = alpha.astype(alpha_ref.dtype)


def attention(enc_img, hidden, params, *, block_b=None, matmul_dtype=None):
    """enc_img: (B, N, E); hidden: (B, D). Returns (context (B,E), alpha (B,N))."""
    B, N, E = enc_img.shape
    A = params["w_e"].shape[1]

    # Hoisted decoder projection: one batched GEMM in XLA (an M=1 matmul per
    # grid step inside the kernel would be near-zero MXU utilization).
    dec_att = hidden @ params["w_d"] + params["b_d"]               # (B, A)

    if block_b is None:
        block_b = B
    assert B % block_b == 0, "batch must be divisible by block_b"
    # (8,128)-rule: a 2-D block's second-to-last dim must be a multiple of 8
    # or span the full array.
    assert block_b == B or block_b % 8 == 0
    grid = (B // block_b,)

    kernel = partial(attention_kernel, matmul_dtype=matmul_dtype)

    ctx, alpha = pl.pallas_call(
        kernel,
        out_shape=(
            jax.ShapeDtypeStruct((B, E), enc_img.dtype),
            jax.ShapeDtypeStruct((B, N), enc_img.dtype),           # lane-dense
        ),
        grid_spec=pltpu.PrefetchScalarGridSpec(
            num_scalar_prefetch=0,
            grid=grid,
            in_specs=[
                pl.BlockSpec((block_b, N, E), lambda b: (b, 0, 0)),  # enc_img
                pl.BlockSpec((block_b, A), lambda b: (b, 0)),        # dec_att
                pl.BlockSpec((E, A), lambda b: (0, 0)),              # w_e
                pl.BlockSpec((1, A), lambda b: (0, 0)),              # b_e
                pl.BlockSpec((1, A), lambda b: (0, 0)),              # w_f (row)
                pl.BlockSpec(memory_space=pltpu.MemorySpace.SMEM),   # b_f scalar
            ],
            out_specs=[
                pl.BlockSpec((block_b, E), lambda b: (b, 0)),        # context
                pl.BlockSpec((block_b, N), lambda b: (b, 0)),        # alpha
            ],
        ),
        compiler_params=pltpu.CompilerParams(
            dimension_semantics=("parallel",),      # batch blocks independent
            vmem_limit_bytes=64 << 20,
        ),
    )(enc_img, dec_att,
      params["w_e"], params["b_e"], params["w_f"], params["b_f"])

    return ctx, alpha


def init_params(key, encoder_dim, decoder_dim, attention_dim):
    ks = jax.random.split(key, 6)

    def lin(kw, kb, fan_in, fan_out):
        bound = 1.0 / np.sqrt(fan_in)
        w = jax.random.uniform(kw, (fan_in, fan_out), jnp.float32, -bound, bound)
        b = jax.random.uniform(kb, (fan_out,), jnp.float32, -bound, bound)
        return w, b

    w_e, b_e = lin(ks[0], ks[1], encoder_dim, attention_dim)
    w_d, b_d = lin(ks[2], ks[3], decoder_dim, attention_dim)
    w_f, b_f = lin(ks[4], ks[5], attention_dim, 1)
    return {
        "w_e": w_e, "b_e": b_e[None, :],          # (E, A), (1, A)
        "w_d": w_d, "b_d": b_d,                   # (D, A), (A,)
        "w_f": w_f.T, "b_f": b_f,                 # row (1, A), scalar (1,)
    }


if __name__ == "__main__":
    B, N = 2, 16                 # batch, num_pixels
    E, D, A = 32, 32, 32         # encoder_dim, decoder_dim, attention_dim

    key = jax.random.PRNGKey(0)
    k_enc, k_hid, k_par = jax.random.split(key, 3)

    enc_img = jax.random.normal(k_enc, (B, N, E), jnp.float32)
    hidden = jax.random.normal(k_hid, (B, D), jnp.float32)
    params = init_params(k_par, E, D, A)

    # f32 operands for the numerical check; pass matmul_dtype=jnp.bfloat16 on
    # v6e/v7x for ~4x MXU throughput (f32 accumulation kept).
    context, alpha = attention(enc_img, hidden, params, block_b=B)
    jax.block_until_ready((context, alpha))

    # Pure-JAX reference.
    enc_att = enc_img @ params["w_e"] + params["b_e"][0]
    dec_att = hidden @ params["w_d"] + params["b_d"]
    s = jnp.maximum(enc_att + dec_att[:, None, :], 0.0)
    a = jnp.sum(s * params["w_f"][0], axis=-1) + params["b_f"][0]
    alpha_ref = jax.nn.softmax(a, axis=1)
    ctx_ref = jnp.sum(enc_img * alpha_ref[..., None], axis=1)

    assert np.allclose(np.asarray(context), np.asarray(ctx_ref), atol=1e-5, rtol=1e-5)
    assert np.allclose(np.asarray(alpha), np.asarray(alpha_ref), atol=1e-5, rtol=1e-5)
    print("KERNEL_OK")
</pallas_src>

<mosaic_0001>
module attributes {stable_mosaic.version = 11 : i64} {
  func.func @attention_kernel(%arg0: i32, %arg1: memref<2x16x32xf32, #tpu.memory_space<vmem>>, %arg2: memref<2x32xf32, #tpu.memory_space<vmem>>, %arg3: memref<32x32xf32, #tpu.memory_space<vmem>>, %arg4: memref<1x32xf32, #tpu.memory_space<vmem>>, %arg5: memref<1x32xf32, #tpu.memory_space<vmem>>, %arg6: memref<1xf32, #tpu.memory_space<smem>>, %arg7: memref<2x32xf32, #tpu.memory_space<vmem>>, %arg8: memref<2x16xf32, #tpu.memory_space<vmem>>) attributes {dimension_semantics = [#tpu.dimension_semantics<parallel>], iteration_bounds = array<i64: 1>, scalar_prefetch = 0 : i64, scratch_operands = 0 : i64, tpu.core_type = #tpu.core_type<tc>, window_params = [{transform_indices = @transform_0, window_bounds = array<i64: 2, 16, 32>}, {transform_indices = @transform_1, window_bounds = array<i64: 2, 32>}, {pipeline_mode = #tpu.pipeline_mode<synchronous>, transform_indices = @transform_2, window_bounds = array<i64: 32, 32>}, {pipeline_mode = #tpu.pipeline_mode<synchronous>, transform_indices = @transform_3, window_bounds = array<i64: 1, 32>}, {pipeline_mode = #tpu.pipeline_mode<synchronous>, transform_indices = @transform_4, window_bounds = array<i64: 1, 32>}, {transform_indices = @transform_5, window_bounds = array<i64: 1>}, {transform_indices = @transform_6, window_bounds = array<i64: 2, 32>}, {transform_indices = @transform_7, window_bounds = array<i64: 2, 16>}]} {
    %c0 = arith.constant 0 : index
    %c0_0 = arith.constant 0 : index
    %c0_1 = arith.constant 0 : index
    %0 = vector.load %arg1[%c0, %c0_0, %c0_1] : memref<2x16x32xf32, #tpu.memory_space<vmem>>, vector<2x16x32xf32>
    %1 = vector.shape_cast %0 : vector<2x16x32xf32> to vector<32x32xf32>
    %c0_2 = arith.constant 0 : index
    %c0_3 = arith.constant 0 : index
    %2 = vector.load %arg3[%c0_2, %c0_3] : memref<32x32xf32, #tpu.memory_space<vmem>>, vector<32x32xf32>
    %cst = arith.constant dense<0.000000e+00> : vector<32x32xf32>
    %3 = tpu.matmul %1, %2, %cst {dimension_numbers = #tpu.dot_dimension_numbers<[1], [0], [0], [1], [0, 0, 1, 1], [], []>} : vector<32x32xf32>, vector<32x32xf32>, vector<32x32xf32> -> vector<32x32xf32>
    %c0_4 = arith.constant 0 : index
    %c0_5 = arith.constant 0 : index
    %4 = vector.load %arg4[%c0_4, %c0_5] : memref<1x32xf32, #tpu.memory_space<vmem>>, vector<1x32xf32>
    %5 = vector.broadcast %4 : vector<1x32xf32> to vector<32x32xf32>
    %6 = arith.addf %3, %5 : vector<32x32xf32>
    %7 = vector.shape_cast %6 : vector<32x32xf32> to vector<2x16x32xf32>
    %c0_6 = arith.constant 0 : index
    %c0_7 = arith.constant 0 : index
    %8 = vector.load %arg2[%c0_6, %c0_7] : memref<2x32xf32, #tpu.memory_space<vmem>>, vector<2x32xf32>
    %9 = vector.shape_cast %8 : vector<2x32xf32> to vector<2x1x32xf32>
    %10 = vector.broadcast %9 : vector<2x1x32xf32> to vector<2x16x32xf32>
    %11 = arith.addf %7, %10 : vector<2x16x32xf32>
    %cst_8 = arith.constant 0.000000e+00 : f32
    %12 = vector.broadcast %cst_8 : f32 to vector<2x16x32xf32>
    %13 = arith.maximumf %11, %12 : vector<2x16x32xf32>
    %c0_9 = arith.constant 0 : index
    %c0_10 = arith.constant 0 : index
    %14 = vector.load %arg5[%c0_9, %c0_10] : memref<1x32xf32, #tpu.memory_space<vmem>>, vector<1x32xf32>
    %15 = vector.shape_cast %14 : vector<1x32xf32> to vector<1x1x32xf32>
    %16 = vector.broadcast %15 : vector<1x1x32xf32> to vector<2x16x32xf32>
    %17 = arith.mulf %13, %16 : vector<2x16x32xf32>
    %cst_11 = arith.constant dense<0.000000e+00> : vector<2x16xf32>
    %18 = vector.multi_reduction <add>, %17, %cst_11 [2] : vector<2x16x32xf32> to vector<2x16xf32>
    %c0_12 = arith.constant 0 : index
    %19 = memref.load %arg6[%c0_12] : memref<1xf32, #tpu.memory_space<smem>>
    %20 = vector.broadcast %19 : f32 to vector<2x16xf32>
    %21 = arith.addf %18, %20 : vector<2x16xf32>
    %cst_13 = arith.constant dense<0xFF800000> : vector<2xf32>
    %22 = vector.multi_reduction <maximumf>, %21, %cst_13 [1] : vector<2x16xf32> to vector<2xf32>
    %23 = vector.shape_cast %22 : vector<2xf32> to vector<2x1xf32>
    %24 = vector.broadcast %23 : vector<2x1xf32> to vector<2x16xf32>
    %25 = arith.subf %21, %24 : vector<2x16xf32>
    %26 = math.exp %25 : vector<2x16xf32>
    %cst_14 = arith.constant dense<0.000000e+00> : vector<2xf32>
    %27 = vector.multi_reduction <add>, %26, %cst_14 [1] : vector<2x16xf32> to vector<2xf32>
    %28 = vector.shape_cast %27 : vector<2xf32> to vector<2x1xf32>
    %29 = vector.broadcast %28 : vector<2x1xf32> to vector<2x16xf32>
    %30 = arith.divf %26, %29 : vector<2x16xf32>
    %31 = vector.shape_cast %30 : vector<2x16xf32> to vector<2x1x16xf32>
    "tpu.trace_start"() <{level = 10 : i32, message = "bqn,bne->bqe"}> : () -> ()
    %cst_15 = arith.constant dense<0.000000e+00> : vector<2x1x32xf32>
    %32 = tpu.matmul %31, %0, %cst_15 {dimension_numbers = #tpu.dot_dimension_numbers<[2], [1], [1], [2], [0, 0, 0, 1, 1, 2], [0], [0]>} : vector<2x1x16xf32>, vector<2x16x32xf32>, vector<2x1x32xf32> -> vector<2x1x32xf32>
    "tpu.trace_stop"() : () -> ()
    %33 = vector.shape_cast %32 : vector<2x1x32xf32> to vector<2x32xf32>
    %c0_16 = arith.constant 0 : index
    %c0_17 = arith.constant 0 : index
    %34 = vector.load %arg7[%c0_16, %c0_17] : memref<2x32xf32, #tpu.memory_space<vmem>>, vector<2x32xf32>
    tpu.vector_store %arg7[%c0_16, %c0_17], %33 {strides = array<i32>} : memref<2x32xf32, #tpu.memory_space<vmem>>, vector<2x32xf32>,
    %c0_18 = arith.constant 0 : index
    %c0_19 = arith.constant 0 : index
    %35 = vector.load %arg8[%c0_18, %c0_19] : memref<2x16xf32, #tpu.memory_space<vmem>>, vector<2x16xf32>
    tpu.vector_store %arg8[%c0_18, %c0_19], %30 {strides = array<i32>} : memref<2x16xf32, #tpu.memory_space<vmem>>, vector<2x16xf32>,
    return
  }
  func.func @transform_0(%arg0: i32) -> (i32, i32, i32) {
    %c0_i32 = arith.constant 0 : i32
    %c0_i32_0 = arith.constant 0 : i32
    %c0_i32_1 = arith.constant 0 : i32
    return %arg0, %c0_i32, %c0_i32_0 : i32, i32, i32
  }
  func.func @transform_1(%arg0: i32) -> (i32, i32) {
    %c0_i32 = arith.constant 0 : i32
    %c0_i32_0 = arith.constant 0 : i32
    return %arg0, %c0_i32 : i32, i32
  }
  func.func @transform_2(%arg0: i32) -> (i32, i32) {
    %c0_i32 = arith.constant 0 : i32
    %c0_i32_0 = arith.constant 0 : i32
    %c0_i32_1 = arith.constant 0 : i32
    return %c0_i32, %c0_i32_0 : i32, i32
  }
  func.func @transform_3(%arg0: i32) -> (i32, i32) {
    %c0_i32 = arith.constant 0 : i32
    %c0_i32_0 = arith.constant 0 : i32
    %c0_i32_1 = arith.constant 0 : i32
    return %c0_i32, %c0_i32_0 : i32, i32
  }
  func.func @transform_4(%arg0: i32) -> (i32, i32) {
    %c0_i32 = arith.constant 0 : i32
    %c0_i32_0 = arith.constant 0 : i32
    %c0_i32_1 = arith.constant 0 : i32
    return %c0_i32, %c0_i32_0 : i32, i32
  }
  func.func @transform_5(%arg0: i32) -> i32 {
    %c0_i32 = arith.constant 0 : i32
    %c0_i32_0 = arith.constant 0 : i32
    return %c0_i32 : i32
  }
  func.func @transform_6(%arg0: i32) -> (i32, i32) {
    %c0_i32 = arith.constant 0 : i32
    %c0_i32_0 = arith.constant 0 : i32
    return %arg0, %c0_i32 : i32, i32
  }
  func.func @transform_7(%arg0: i32) -> (i32, i32) {
    %c0_i32 = arith.constant 0 : i32
    %c0_i32_0 = arith.constant 0 : i32
    return %arg0, %c0_i32 : i32, i32
  }
}

</mosaic_0001>

<bundles_post_ra>
// kernel: tpu_custom_call.1
= control target key start
LH: loop header
LB: loop body
LE: loop exit
PB: predicated region body
PF: predicated region fallthrough
CT: control target
= control target key end

     0   :  { %14 = vsyncpa [#allocation4], 0  ;;  %s876_s0 = inlined_call_operand.hbm [shape: f32[2,16,32], index: 0, kind: input, shape index: {}]   ;;  %s877_s1 = inlined_call_operand.vmem [shape: f32[2,32], index: 1, kind: input, shape index: {}]   ;;  %s878_s2 = inlined_call_operand.hbm [shape: f32[32,32], index: 2, kind: input, shape index: {}]   ;;  %s879_s3 = inlined_call_operand.vmem [shape: f32[1,32], index: 3, kind: input, shape index: {}]   ;;  %s880_s4 = inlined_call_operand.vmem [shape: f32[1,32], index: 4, kind: input, shape index: {}]   ;;  %s881_s5 = inlined_call_operand.<no memory space> [shape: f32[1], index: 5, kind: input, shape index: {}]   ;;  %s882_s6 = inlined_call_operand.hbm [shape: f32[2,32], index: 6, kind: output, shape index: {0}]   ;;  %s883_s7 = inlined_call_operand.hbm [shape: f32[2,16], index: 7, kind: output, shape index: {1}]  }
   0x1   :  { %15 = vsyncpa [#allocation7], 0 }
   0x2   :  { %16 = vsyncpa [#allocation5], 0 }
   0x3   :  { %17 = vsyncpa [#allocation10], 0  ;;  %s734_s24 = smov [#allocation3]  }
   0x4   :  { %s23_s25 = sshll.u32 %s734_s24, 4  ;;  %s24_s25 = int_to_ptr.vmem [resolvable:$true] %s23_s25 }
   0x5   :  { %s654_s26 = scalar_lea.vmem %s24_s25, 512  ;;  %p659_p1 = scmp.lt.s32.totalorder %s24_s25, %s24_s25 }
   0x6   :  { %p655_p0 = scmp.ne.s32.totalorder %s24_s25, %s654_s26  ;;  %p660_p2 = scmp.lt.s32.totalorder %s654_s26, %s654_s26 }
   0x8   :  { %p661_p3 = por %p660_p2, %p659_p1 }
   0xa   :  { %p662_p4 = pnand %p661_p3, %p655_p0 }
   0xc   :  { %665 = shalt.err (!%p662_p4)
}
   0xd   :  { %s735_s27 = smov 128   ;;  %s736_s28 = smov 8  }
   0xe   :  { %29 = dma.hbm_to_vmem [thread:$0]  %s876_s0, 512, %s24_s25, [#allocation4], %s735_s27, %s735_s27, %s736_s28  }
   0xf   :  { %s737_s8 = smov [#allocation6]  }
  0x10   :  { %s37_s9 = sshll.u32 %s737_s8, 4  ;;  %s38_s9 = int_to_ptr.vmem [resolvable:$true] %s37_s9 }
  0x11   :  { %s674_s10 = scalar_lea.vmem %s38_s9, 512  ;;  %p679_p6 = scmp.lt.s32.totalorder %s38_s9, %s38_s9 }
  0x12   :  { %p675_p5 = scmp.ne.s32.totalorder %s38_s9, %s674_s10  ;;  %p680_p7 = scmp.lt.s32.totalorder %s674_s10, %s674_s10 }
  0x14   :  { %p681_p8 = por %p680_p7, %p679_p6 }
  0x16   :  { %p682_p9 = pnand %p681_p8, %p675_p5 }
  0x18   :  { %685 = shalt.err (!%p682_p9)
}
  0x19   :  { %43 = dma.hbm_to_vmem [thread:$0]  %s878_s2, 512, %s38_s9, [#allocation7], %s735_s27, %s735_s27, %s736_s28  }
  0x1a   :  { %726 = dma.done.wait [#allocation4], 512  }
  0x1b   :  { %727 = vsyncadd [#allocation4], 4294966784 }
  0x1c   :  { %728 = dma.done.wait [#allocation7], 512  }
  0x1d   :  { %729 = vsyncadd [#allocation7], 4294966784  ;;  %vm71_vm0 = vcmask 261120   ;;  %v63_v0 = vld [vmem:[#allocation6 + $0x18] sm:$0xff]  ;;  %v62_v1 = vld [vmem:[#allocation6 + $0x10] sm:$0xff]  ;;  %v182_v10 = vlaneseq  ;;  %v235_v50 = vstv %s881_s5  ;;  %vm255_vm1 = vcmask 130112  }
  0x1e   :  { %594 = vmatprep.subr.mxu0 %v63_v0  ;;  %v790_v2 = vld [vmem:[#allocation3] sm:$0xff]  ;;  %v61_v3 = vld [vmem:[#allocation6 + $0x8] sm:$0xff]  ;;  %v796_v6 = vld [vmem:[#allocation3 + $0x10] sm:$0xff]  ;;  %v738_v8 = vmov 1966171168   ;;  %vm266_vm2 = vcmask 1041409  }
  0x1f   :  { %595 = vmatpush3.msra.mxu0 %v63_v0  ;;  %602 = vmatprep.mubr.msk.f32.mxu0 %vm71_vm0, %v790_v2  ;;  %v60_v4 = vld [vmem:[#allocation6] sm:$0xff]  ;;  %v794_v5 = vld [vmem:[#allocation3 + $0x8] sm:$0xff]  ;;  %v802_v7 = vld [vmem:[#allocation3 + $0x18] sm:$0xff]  ;;  %v180_v9 = vunpack.c.l.s4 %v738_v8  ;;  %v806_v12 = vshrl.u32 %v182_v10, 7  ;;  %v245_v47 = vand.u32 127, %v182_v10  ;;  %vm269_vm3 = vcmask 123904  }
  0x20   :  { %596 = vmatprep.subr.mxu0 %v62_v1  ;;  %v576_v14 = vld.sshfl [vmem:[%s877_s1] sm:$0x11 pattern:$0x75316420]  ;;  %v739_v8 = vmov 0   ;;  %vm741_vm4 = vmmov 0  }
  0x21   :  { %597 = vmatpush3.msra.mxu0 %v62_v1  ;;  %v181_v11 = vunpack.c.0.s8 %v180_v9  ;;  %v813_v16 = vsub.s32 0, %v806_v12  ;;  %v178_v17 = vcombine.high %v576_v14, %v576_v14  ;;  %v571_v18 = vld [vmem:[%s879_s3] ss:$0 sm:$0xff]  ;;  %v250_v49 = vadd.s32 4294967288, %v245_v47  ;;  %633 = vset.pattern.permute.xlu0 %v739_v8  ;;  %s742_s5 = smov [#allocation9]  }
  0x22   :  { %598 = vmatprep.subr.mxu0 %v61_v3  ;;  %v577_v35 = vld [vmem:[%s880_s4] ss:$0 sm:$0xff]  ;;  %v834_v55 = vsub.s32 %v245_v47, %v806_v12  ;;  %632 = vset.pattern.permute.xlu1 %v739_v8  ;;  %v280_v9 = vsub.s32 1, %v806_v12  ;;  %vm369_vm5 = vcmask 130048   ;;  %s557_s16 = sshll.u32 %s742_s5, 4  ;;  %s558_s16 = int_to_ptr.vmem [resolvable:$true] %s557_s16 }
  0x23   :  { %599 = vmatpush3.msra.mxu0 %v61_v3  ;;  %v184_v13 = vsub.s32 %v181_v11, %v806_v12  ;;  %v831_v53 = vsub.s32 %v250_v49, %v806_v12  ;;  %s686_s17 = scalar_lea.vmem %s558_s16, 32  ;;  %p691_p11 = scmp.lt.s32.totalorder %s558_s16, %s558_s16 }
  0x24   :  { %600 = vmatprep.subr.mxu0 %v60_v4  ;;  %p687_p10 = scmp.ne.s32.totalorder %s558_s16, %s686_s17  ;;  %p692_p12 = scmp.lt.s32.totalorder %s686_s17, %s686_s17 }
  0x25   :  { %601 = vmatpush3.msra.mxu0 %v60_v4  ;;  %v185_v15 = vrot.slane %v576_v14, %v184_v13  ;;  %v192_v20 = vrot.slane %v178_v17, %v184_v13 }
  0x26   :  { %603 = vmatmul.mubr.msk.f32.vlgmr.msra.gmra.mxu0 %vm71_vm0, %v794_v5  ;;  %p693_p13 = por %p692_p12, %p691_p11 }
  0x27   :  { %605 = vmatprep.mubr.msk.f32.mxu0 %vm71_vm0, %v796_v6  ;;  %v196_v19 = vrot.slane %v185_v15, %v813_v16  ;;  %v200_v26 = vrot.slane %v192_v20, %v813_v16 }
  0x28   :  { %p694_p0 = pnand %p693_p13, %p687_p10 }
  0x2a   :  { %606 = vmatmul.mubr.msk.f32.gmra.mxu0 %vm71_vm0, %v802_v7 }
  0xe6   :  { %v604_v21 = vpop.f32.mrf.mxu0 }
  0xe7   :  { %v156_v22 = vadd.f32 %v604_v21, %v571_v18 }
  0xe8   :  { %v150_v23 = vpop.f32.mrf.mxu0 }
  0xe9   :  { %v204_v24 = vadd.f32 %v196_v19, %v156_v22  ;;  %v151_v25 = vadd.f32 %v571_v18, %v150_v23 }
  0xea   :  { %v607_v27 = vpop.f32.mrf.mxu0 }
  0xeb   :  { %v203_v28 = vadd.f32 %v196_v19, %v151_v25  ;;  %v166_v29 = vadd.f32 %v607_v27, %v571_v18  ;;  %v208_v31 = vmax.f32 %v204_v24, 0.0 }
  0xec   :  { %v160_v30 = vpop.f32.mrf.mxu0 }
  0xed   :  { %v207_v32 = vmax.f32 %v203_v28, 0.0  ;;  %v206_v33 = vadd.f32 %v200_v26, %v166_v29  ;;  %v161_v34 = vadd.f32 %v571_v18, %v160_v30  ;;  %v219_v41 = vmul.f32 %v577_v35, %v208_v31 }
  0xef   :  { %v205_v36 = vadd.f32 %v200_v26, %v161_v34  ;;  %v218_v37 = vmul.f32 %v577_v35, %v207_v32  ;;  %v210_v38 = vmax.f32 %v206_v33, 0.0  ;;  %v225_v44 = vsel %vm71_vm0, %v219_v41, 0.0 }
  0xf1   :  { %v209_v39 = vmax.f32 %v205_v36, 0.0  ;;  %v222_v40 = vsel %vm71_vm0, %v218_v37, 0.0  ;;  %v221_v45 = vmul.f32 %v577_v35, %v210_v38 }
  0xf2   :  { %223 = vadd.xlane.f32.xlu0 %v222_v40 }
  0xf3   :  { %v220_v42 = vmul.f32 %v577_v35, %v209_v39  ;;  %v231_v46 = vsel %vm71_vm0, %v221_v45, 0.0 }
  0xf5   :  { %v228_v43 = vsel %vm71_vm0, %v220_v42, 0.0  ;;  %v740_v42 = vmov 0.0  }
  0xf6   :  { %229 = vadd.xlane.f32.xlu1 %v228_v43  ;;  %226 = vadd.xlane.f32.xlu0 %v225_v44 }
  0xf7   :  { %608 = vmatprep.subr.mxu1 %v740_v42  ;;  %612 = vmatprep.mubr.msk.f32.mxu1 %vm741_vm4, %v740_v42 }
  0xf8   :  { %609 = vmatpush3.msra.mxu1 %v794_v5 }
  0xf9   :  { %610 = vmatprep.subr.mxu1 %v740_v42 }
  0xfa   :  { %232 = vadd.xlane.f32.xlu1 %v231_v46  ;;  %611 = vmatpush3.msra.mxu1 %v790_v2 }
  0xfb   :  { %615 = vmatprep.subr.mxu1 %v740_v42 }
 0x17b   :  { %v224_v48 = vpop.xlane.xlu0 %223 }
 0x17c   :  { %v236_v56 = vadd.f32 %v235_v50, %v224_v48 }
 0x17e   :  { %v249_v61 = vrot.slane %v236_v56, %v834_v55 }
 0x17f   :  { %v230_v51 = vpop.xlane.xlu1 %229  ;;  %v227_v52 = vpop.xlane.xlu0 %226 }
 0x180   :  { %v237_v54 = vadd.f32 %v235_v50, %v227_v52  ;;  %v238_v57 = vadd.f32 %v235_v50, %v230_v51 }
 0x182   :  { %v254_v59 = vrot.slane %v237_v54, %v831_v53  ;;  %v260_v62 = vrot.slane %v238_v57, %v834_v55 }
 0x183   :  { %v233_v58 = vpop.xlane.xlu1 %232 }
 0x184   :  { %v239_v60 = vadd.f32 %v235_v50, %v233_v58  ;;  %v256_v0 = vsel %vm255_vm1, %v254_v59, %v249_v61 }
 0x186   :  { %v264_v63 = vrot.slane %v239_v60, %v831_v53 }
 0x188   :  { %v265_v1 = vsel %vm255_vm1, %v264_v63, %v260_v62 }
 0x189   :  { %v267_v3 = vsel %vm266_vm2, %v265_v1, %v256_v0 }
 0x18a   :  { %v270_v4 = vsel %vm269_vm3, %v267_v3, -inf }
 0x18b   :  { %271 = vmax.xlane.f32.xlu0 %v270_v4 }
 0x214   :  { %v272_v10 = vpop.xlane.xlu0 %271 }
 0x215   :  { %v277_v11 = vrot.slane %v272_v10, %v813_v16  ;;  %v281_v13 = vrot.slane %v272_v10, %v280_v9 }
 0x217   :  { %v284_v14 = vsub.f32 %v236_v56, %v277_v11  ;;  %v285_v15 = vsub.f32 %v237_v54, %v277_v11  ;;  %v286_v17 = vsub.f32 %v238_v57, %v281_v13  ;;  %v287_v20 = vsub.f32 %v239_v60, %v281_v13 }
 0x219   :  { %v288_v18 = vmul.f32 1.442695, %v284_v14  ;;  %v290_v19 = vmul.f32 1.442695, %v285_v15  ;;  %v292_v21 = vmul.f32 1.442695, %v286_v17 }
 0x21a   :  { %v294_v22 = vmul.f32 1.442695, %v287_v20 }
 0x21b   :  { %634 = vpow2.f32 %v288_v18 }
 0x21c   :  { %636 = vpow2.f32 %v290_v19 }
 0x21d   :  { %638 = vpow2.f32 %v292_v21 }
 0x21e   :  { %640 = vpow2.f32 %v294_v22 }
 0x228   :  { %v635_v23 = vpop.eup %634 }
 0x229   :  { %v637_v24 = vpop.eup %636  ;;  %301 = vperm.xlu1 %632, %v635_v23  }
 0x22a   :  { %304 = vperm.xlu0 %633, %v637_v24   ;;  %v639_v12 = vpop.eup %638 }
 0x22b   :  { %v641_v25 = vpop.eup %640 }
 0x22d   :  { %307 = vperm.xlu1 %632, %v639_v12  }
 0x231   :  { %310 = vperm.xlu1 %632, %v641_v25  }
 0x2a4   :  { %v302_v26 = vpop.permute.xlu1 %301 }
 0x2a5   :  { %v305_v27 = vpop.permute.xlu0 %304  ;;  %v315_v30 = vrot.slane %v302_v26, %v834_v55 }
 0x2a6   :  { %v319_v29 = vrot.slane %v305_v27, %v831_v53 }
 0x2a8   :  { %v308_v28 = vpop.permute.xlu1 %307  ;;  %v320_v34 = vsel %vm255_vm1, %v319_v29, %v315_v30 }
 0x2a9   :  { %v324_v32 = vrot.slane %v308_v28, %v834_v55 }
 0x2ac   :  { %v311_v31 = vpop.permute.xlu1 %310 }
 0x2ad   :  { %v328_v33 = vrot.slane %v311_v31, %v831_v53 }
 0x2af   :  { %v329_v35 = vsel %vm255_vm1, %v328_v33, %v324_v32 }
 0x2b0   :  { %v330_v36 = vsel %vm266_vm2, %v329_v35, %v320_v34 }
 0x2b1   :  { %v332_v37 = vsel %vm269_vm3, %v330_v36, 0.0 }
 0x2b2   :  { %333 = vadd.xlane.f32.xlu1 %v332_v37 }
 0x33b   :  { %v334_v38 = vpop.xlane.xlu1 %333 }
 0x33c   :  { %v339_v39 = vrot.slane %v334_v38, %v813_v16  ;;  %v343_v40 = vrot.slane %v334_v38, %v280_v9 }
 0x33e   :  { %642 = vrcp.f32 %v339_v39 }
 0x33f   :  { %644 = vrcp.f32 %v343_v40 }
 0x34b   :  { %v643_v41 = vpop.eup %642 }
 0x34c   :  { %v347_v43 = vmul.f32 %v643_v41, %v635_v23  ;;  %v348_v44 = vmul.f32 %v643_v41, %v637_v24  ;;  %v645_v45 = vpop.eup %644 }
 0x34d   :  { %v350_v16 = vmul.f32 %v645_v45, %v639_v12  ;;  %v351_v46 = vmul.f32 %v645_v45, %v641_v25 }
 0x34e   :  { %355 = vperm.xlu0 %633, %v347_v43  }
 0x352   :  { %358 = vperm.xlu0 %633, %v348_v44  }
 0x356   :  { %445 = vperm.xlu0 %633, %v350_v16  }
 0x35a   :  { %448 = vperm.xlu0 %633, %v351_v46  }
 0x3c9   :  { %v356_v47 = vpop.permute.xlu0 %355 }
 0x3ca   :  { %v363_v49 = vrot.slane %v356_v47, %v834_v55 }
 0x3cd   :  { %v359_v48 = vpop.permute.xlu0 %358 }
 0x3ce   :  { %v367_v5 = vrot.slane %v359_v48, %v831_v53 }
 0x3d0   :  { %v368_v2 = vsel %vm255_vm1, %v367_v5, %v363_v49 }
 0x3d1   :  { %613 = vmatmul.mubr.msk.f32.vlgmr.msra.gmra.mxu1 %vm369_vm5, %v368_v2  ;;  %v446_v50 = vpop.permute.xlu0 %445 }
 0x3d2   :  { %616 = vmatpush3.msra.mxu1 %v802_v7  ;;  %619 = vmatprep.mubr.msk.f32.mxu1 %vm741_vm4, %v740_v42  ;;  %v453_v52 = vrot.slane %v446_v50, %v834_v55 }
 0x3d3   :  { %617 = vmatprep.subr.mxu1 %v740_v42 }
 0x3d4   :  { %618 = vmatpush3.msra.mxu1 %v796_v6 }
 0x3d5   :  { %v449_v51 = vpop.permute.xlu0 %448 }
 0x3d6   :  { %v457_v54 = vrot.slane %v449_v51, %v831_v53 }
 0x3d8   :  { %v458_v56 = vsel %vm255_vm1, %v457_v54, %v453_v52 }
 0x3d9   :  { %620 = vmatmul.mubr.msk.f32.vlgmr.msra.gmra.mxu1 %vm369_vm5, %v458_v56  ;;  %v538_v57 = vsel %vm266_vm2, %v458_v56, %v368_v2 }
 0x3da   :  { %540 = vst.msk [vmem:[#allocation9] sm:$0x3] %vm269_vm3, %v538_v57 }
 0x3db   :  { %697 = shalt.err (!%p694_p0)
}
 0x3dc   :  { %560 = dma.vmem_to_hbm [thread:$0]  %s558_s16, 32, %s883_s7, [#allocation10]   ;;  %vm536_vm6 = vcmask 254976  }
 0x3dd   :  { %s743_s20 = smov [#allocation8]  }
 0x3de   :  { %s547_s21 = sshll.u32 %s743_s20, 4  ;;  %s548_s21 = int_to_ptr.vmem [resolvable:$true] %s547_s21 }
 0x3df   :  { %s706_s22 = scalar_lea.vmem %s548_s21, 32  ;;  %p711_p2 = scmp.lt.s32.totalorder %s548_s21, %s548_s21 }
 0x3e0   :  { %p707_p1 = scmp.ne.s32.totalorder %s548_s21, %s706_s22  ;;  %p712_p3 = scmp.lt.s32.totalorder %s706_s22, %s706_s22 }
 0x3e2   :  { %p713_p4 = por %p712_p3, %p711_p2 }
 0x3e4   :  { %p714_p5 = pnand %p713_p4, %p707_p1 }
 0x491   :  { %v438_v6 = vpop.f32.mrf.mxu1 }
 0x493   :  { %v614_v7 = vpop.f32.mrf.mxu1 }
 0x499   :  { %v527_v53 = vpop.f32.mrf.mxu1 }
 0x49a   :  { %v533_v55 = vrot.slane %v527_v53, 7 }
 0x49b   :  { %v621_v58 = vpop.f32.mrf.mxu1 }
 0x49c   :  { %v534_v59 = vsel %vm266_vm2, %v533_v55, %v438_v6 }
 0x49d   :  { %537 = vst.msk [vmem:[#allocation8] sm:$0x3] %vm536_vm6, %v534_v59 }
 0x49e   :  { %717 = shalt.err (!%p714_p5)
}
 0x49f   :  { %550 = dma.vmem_to_hbm [thread:$0]  %s548_s21, 32, %s882_s6, [#allocation5]  }
 0x4a0   :  { %730 = dma.done.wait [#allocation5], 32  }
 0x4a1   :  { %731 = vsyncadd [#allocation5], 4294967264 }
 0x4a2   :  { %732 = dma.done.wait [#allocation10], 32  }
 0x4a3   :  { %733 = vsyncadd [#allocation10], 4294967264 }
 0x4a4   :  { %567 = vsyncpa [#allocation4], 1 }
 0x4a5   :  { %568 = vsyncpa [#allocation7], 1 }
 0x4a6   :  { %569 = vsyncpa [#allocation5], 1 }
 0x4a7   :  { %570 = vsyncpa [#allocation10], 1 }

</bundles_post_ra>
